<compile_context>
chip_gen: v7x
topology: tpu7x:2x2x1
jax: 0.10.0
libtpu: 0.0.40
codegen_flags: <defaults>
</compile_context>

<pallas_src>
import functools

import jax
import jax.numpy as jnp
from jax.experimental import pallas as pl
from jax.experimental.pallas import tpu as pltpu

EPS = 1e-6
LANE = 128
TM_GRAN = 256          # fills v6e/v7x 256x256 MXU; multiple of v5e's 128
TM_FLOOR = 128
MIB = 1024 * 1024


def _round_up(x, m):
    return (x + m - 1) // m * m


def _sublane(dtype):
    # sublane granularity for the second-minor dim (f32: 8, bf16: 16, int8: 32)
    return max(8, 32 // jnp.dtype(dtype).itemsize)


@functools.lru_cache(maxsize=1)
def _vmem_capacity_bytes():
    try:
        info = pltpu.get_tpu_info()
        for name in ("vmem_capacity_bytes", "vmem_size_bytes", "vmem_bytes"):
            cap = getattr(info, name, None)
            if cap:
                return int(cap)
    except Exception:
        pass
    return 128 * MIB


# --------------------------------------------------------------------------
# Kernels
# --------------------------------------------------------------------------
def _layer_norm_f32(x, gamma, beta, in_dim):
    """LayerNorm over the true feature width (padded lanes of x are zero).

    No per-step lane mask: the padded-lane contribution to sum((x-mean)^2) is
    (Dp-in_dim)*mean^2 and is removed analytically. gamma/beta are zero in
    padded lanes, so the result is exactly zero there.
    """
    d_pad = x.shape[-1]
    inv_d = 1.0 / in_dim
    mean = jnp.sum(x, axis=-1, keepdims=True) * inv_d
    xc = x - mean
    sq = jnp.sum(xc * xc, axis=-1, keepdims=True)
    if d_pad != in_dim:
        sq = sq - (d_pad - in_dim) * (mean * mean)
    inv = jax.lax.rsqrt(sq * inv_d + EPS)
    return (xc * inv) * gamma + beta


def _mlp_res_kernel(x_ref, gamma_ref, beta_ref, w1_ref, b1_ref, w2_ref, b2_ref,
                    o_ref, *, in_dim):
    """Whole weights resident in VMEM; one fused step per row tile."""
    x = x_ref[...].astype(jnp.float32)                           # (tm, Dp)
    ln = _layer_norm_f32(x, gamma_ref[...], beta_ref[...], in_dim)
    ln = ln if w1_ref.dtype == jnp.float32 else ln.astype(w1_ref.dtype)
    h = jnp.dot(ln, w1_ref[...], preferred_element_type=jnp.float32)
    h = jnp.maximum(h + b1_ref[...], 0.0)
    h = h if w2_ref.dtype == jnp.float32 else h.astype(w2_ref.dtype)
    y = jnp.dot(h, w2_ref[...], preferred_element_type=jnp.float32)
    o_ref[...] = (x + y + b2_ref[...]).astype(o_ref.dtype)


def _mlp_res_kernel_hblk(x_ref, gamma_ref, beta_ref, w1_ref, b1_ref, w2_ref,
                         b2_ref, o_ref, ln_sc, acc_sc, *, in_dim):
    """Hidden-dim-blocked path for weights too large to keep whole in VMEM."""
    j = pl.program_id(1)

    @pl.when(j == 0)
    def _():
        x = x_ref[...].astype(jnp.float32)
        ln_sc[...] = _layer_norm_f32(x, gamma_ref[...], beta_ref[...], in_dim)
        acc_sc[...] = jnp.zeros_like(acc_sc)

    ln = ln_sc[...]
    ln = ln if w1_ref.dtype == jnp.float32 else ln.astype(w1_ref.dtype)
    h = jnp.dot(ln, w1_ref[...], preferred_element_type=jnp.float32)
    h = jnp.maximum(h + b1_ref[...], 0.0)
    h = h if w2_ref.dtype == jnp.float32 else h.astype(w2_ref.dtype)
    acc_sc[...] += jnp.dot(h, w2_ref[...], preferred_element_type=jnp.float32)

    @pl.when(j == pl.num_programs(1) - 1)
    def _():
        x = x_ref[...].astype(jnp.float32)
        o_ref[...] = (x + acc_sc[...] + b2_ref[...]).astype(o_ref.dtype)


# --------------------------------------------------------------------------
# Wrapper
# --------------------------------------------------------------------------
def prepare_params(gamma, beta, w1, b1, w2, b2):
    """Pad params lane-dense and pre-cast the small vectors to f32.

    Static per layer: call once, outside the per-call hot path, and reuse.
    Weights keep their native dtype (f32 or bf16)."""
    in_dim, hid = w1.shape
    Dp = _round_up(in_dim, LANE)
    Hp = _round_up(hid, LANE)

    def pad2(a, rows, cols):
        if a.shape == (rows, cols):
            return a
        return jnp.zeros((rows, cols), a.dtype).at[:a.shape[0], :a.shape[1]].set(a)

    return dict(
        in_dim=in_dim, hid=hid, Dp=Dp, Hp=Hp,
        gamma=pad2(gamma.astype(jnp.float32).reshape(1, in_dim), 1, Dp),
        beta=pad2(beta.astype(jnp.float32).reshape(1, in_dim), 1, Dp),
        w1=pad2(w1, Dp, Hp),
        b1=pad2(b1.astype(jnp.float32).reshape(1, hid), 1, Hp),
        w2=pad2(w2, Hp, Dp),
        b2=pad2(b2.astype(jnp.float32).reshape(1, in_dim), 1, Dp),
    )


def _pick_tm(n_rows, rows_cap, tm_max, sub, two_core):
    """Row tile: biggest MXU-friendly tile within the VMEM row budget."""
    n_up = _round_up(max(n_rows, 1), sub)
    cap = max(sub, min(rows_cap, tm_max))
    if two_core and n_rows >= 2 * TM_FLOOR:
        # keep >= 2 grid steps so both v7x TensorCores get row tiles
        cap = min(cap, _round_up(-(-n_rows // 2), TM_GRAN))
    if n_up <= cap:
        return n_up                           # single grid step
    if cap >= TM_GRAN:
        return cap // TM_GRAN * TM_GRAN       # multiples of 256 fill the MXU
    if cap >= TM_FLOOR:
        return cap // TM_FLOOR * TM_FLOOR     # never below 128 in practice
    return max(sub, cap // sub * sub)         # degenerate fallback (huge dims)


def mlp_res_block(x, params, *, tm_max=512, force_hid_block=None):
    """x: (B, S, in_dim) -> (B, S, in_dim); params from prepare_params()."""
    B, S, in_dim = x.shape
    assert in_dim == params["in_dim"]
    Dp, Hp = params["Dp"], params["Hp"]
    N = B * S
    sub = _sublane(x.dtype)
    x_bytes = jnp.dtype(x.dtype).itemsize
    w_bytes = jnp.dtype(params["w1"].dtype).itemsize

    # ---- generation-aware VMEM budget ------------------------------------
    vmem_cap = _vmem_capacity_bytes()
    small_vmem = vmem_cap <= 80 * MIB                # v7x-class: 64 MiB / TC
    vmem_limit = max(32 * MIB, min(int(0.875 * vmem_cap), 100 * MIB))
    headroom = 2 * MIB
    avail = vmem_limit - headroom

    params_bytes = 2 * Dp * Hp * w_bytes + (3 * Dp + Hp) * 4
    # resident path per-row VMEM: double-buffered x/out tiles + f32 temporaries
    per_row_res = 4 * Dp * x_bytes + 4 * (3 * Dp + Hp)
    resident_weight_max = (24 * MIB if small_vmem
                           else avail - TM_FLOOR * per_row_res)
    use_resident = (force_hid_block is None
                    and params_bytes <= resident_weight_max
                    and avail - params_bytes >= TM_FLOOR * per_row_res)

    if use_resident:
        rows_cap = (avail - params_bytes) // per_row_res
        tm = _pick_tm(N, rows_cap, tm_max, sub, small_vmem)
    else:
        # hidden-blocked path: pick a hidden tile th (multiple of 128, divides Hp)
        params_small = 3 * Dp * 4                    # gamma, beta, b2 (f32)
        if force_hid_block is not None:
            th_cap = _round_up(force_hid_block, LANE)
        else:
            th_cap = max(LANE,
                         int(0.35 * avail) // (4 * Dp * w_bytes) // LANE * LANE)
        th = LANE
        t = LANE
        while t <= Hp:
            if Hp % t == 0 and t <= th_cap:
                th = t
            t += LANE
        wblk_bytes = 4 * Dp * th * w_bytes + 2 * th * 4   # dbl-buffered w1/w2/b1
        per_row_blk = 4 * Dp * x_bytes + 4 * (2 * Dp + th) + 8 * Dp
        rows_cap = max(sub, (avail - params_small - wblk_bytes) // per_row_blk)
        tm = _pick_tm(N, rows_cap, tm_max, sub, small_vmem)

    Np = _round_up(N, tm)

    # ---- input padding, only when actually needed ------------------------
    need_pad = (Dp != in_dim) or (Np != N)
    xf = x.reshape(N, in_dim)
    x_in = xf if not need_pad else (
        jnp.zeros((Np, Dp), x.dtype).at[:N, :in_dim].set(xf))

    vmem_full = pl.BlockSpec(memory_space=pltpu.MemorySpace.VMEM)

    if use_resident:
        out = pl.pallas_call(
            functools.partial(_mlp_res_kernel, in_dim=in_dim),
            out_shape=jax.ShapeDtypeStruct((Np, Dp), x.dtype),
            grid=(Np // tm,),
            in_specs=[
                pl.BlockSpec((tm, Dp), lambda i: (i, 0)),   # x rows (pipelined)
                vmem_full, vmem_full,                       # gamma, beta (f32)
                vmem_full, vmem_full,                       # w1, b1
                vmem_full, vmem_full,                       # w2, b2
            ],
            out_specs=pl.BlockSpec((tm, Dp), lambda i: (i, 0)),
            compiler_params=pltpu.CompilerParams(
                dimension_semantics=("parallel",),
                vmem_limit_bytes=vmem_limit),
        )(x_in, params["gamma"], params["beta"], params["w1"], params["b1"],
          params["w2"], params["b2"])
    else:
        out = pl.pallas_call(
            functools.partial(_mlp_res_kernel_hblk, in_dim=in_dim),
            out_shape=jax.ShapeDtypeStruct((Np, Dp), x.dtype),
            grid=(Np // tm, Hp // th),
            in_specs=[
                pl.BlockSpec((tm, Dp), lambda i, j: (i, 0)),   # x rows
                vmem_full, vmem_full,                          # gamma, beta
                pl.BlockSpec((Dp, th), lambda i, j: (0, j)),   # w1 hidden block
                pl.BlockSpec((1, th), lambda i, j: (0, j)),    # b1 hidden block
                pl.BlockSpec((th, Dp), lambda i, j: (j, 0)),   # w2 hidden block
                vmem_full,                                     # b2
            ],
            out_specs=pl.BlockSpec((tm, Dp), lambda i, j: (i, 0)),
            scratch_shapes=[pltpu.VMEM((tm, Dp), jnp.float32),   # LN cache
                            pltpu.VMEM((tm, Dp), jnp.float32)],  # fc2 f32 acc
            compiler_params=pltpu.CompilerParams(
                dimension_semantics=("parallel", "arbitrary"),
                vmem_limit_bytes=vmem_limit),
        )(x_in, params["gamma"], params["beta"], params["w1"], params["b1"],
          params["w2"], params["b2"])

    if need_pad:
        out = out[:N, :in_dim]
    return out.reshape(B, S, in_dim)


# --------------------------------------------------------------------------
# Reference + tests
# --------------------------------------------------------------------------
def _reference(x, gamma, beta, w1, b1, w2, b2):
    xf = x.astype(jnp.float32)
    mean = jnp.mean(xf, axis=-1, keepdims=True)
    var = jnp.mean((xf - mean) ** 2, axis=-1, keepdims=True)
    ln = (xf - mean) / jnp.sqrt(var + EPS) * gamma.astype(jnp.float32) \
         + beta.astype(jnp.float32)
    h = jnp.maximum(ln @ w1.astype(jnp.float32) + b1.astype(jnp.float32), 0.0)
    y = h @ w2.astype(jnp.float32) + b2.astype(jnp.float32)
    return xf + y


def _make_inputs(key, B, S, in_dim, hid, w_dtype=jnp.float32):
    kx, kg, kb, kw1, kb1, kw2, kb2 = jax.random.split(key, 7)
    x = jax.random.normal(kx, (B, S, in_dim), dtype=jnp.float32)
    gamma = jax.random.normal(kg, (in_dim,), dtype=jnp.float32) * 0.1 + 1.0
    beta = jax.random.normal(kb, (in_dim,), dtype=jnp.float32) * 0.1
    w1 = (jax.random.normal(kw1, (in_dim, hid), dtype=jnp.float32) * 0.05).astype(w_dtype)
    b1 = jax.random.normal(kb1, (hid,), dtype=jnp.float32) * 0.05
    w2 = (jax.random.normal(kw2, (hid, in_dim), dtype=jnp.float32) * 0.05).astype(w_dtype)
    b2 = jax.random.normal(kb2, (in_dim,), dtype=jnp.float32) * 0.05
    return x, gamma, beta, w1, b1, w2, b2


if __name__ == "__main__":
    key = jax.random.PRNGKey(0)
    ks = jax.random.split(key, 4)

    # Case 1: tiny non-aligned dims -> single grid step, lane padding only.
    a1 = _make_inputs(ks[0], B=2, S=8, in_dim=32, hid=64)
    p1 = prepare_params(*a1[1:])
    o1 = jax.block_until_ready(mlp_res_block(a1[0], p1))
    assert o1.shape == a1[0].shape
    assert jnp.allclose(o1, _reference(*a1), atol=1e-4, rtol=1e-4), "case1 mismatch"

    # Case 2: non-aligned dims + multi-step row grid (row + lane padding).
    a2 = _make_inputs(ks[1], B=2, S=133, in_dim=48, hid=96)
    p2 = prepare_params(*a2[1:])
    o2 = jax.block_until_ready(mlp_res_block(a2[0], p2, tm_max=128))
    assert o2.shape == a2[0].shape
    assert jnp.allclose(o2, _reference(*a2), atol=1e-4, rtol=1e-4), "case2 mismatch"

    # Case 3: fully aligned dims and rows -> no wrapper-side pad copies at all.
    a3 = _make_inputs(ks[2], B=1, S=256, in_dim=128, hid=256)
    p3 = prepare_params(*a3[1:])
    o3 = jax.block_until_ready(mlp_res_block(a3[0], p3))
    assert o3.shape == a3[0].shape
    assert jnp.allclose(o3, _reference(*a3), atol=1e-4, rtol=1e-4), "case3 mismatch"

    # Case 4: forced hidden-dim blocking (large-weight fallback path) with
    #         bf16 weights (native-dtype MXU matmuls, f32 accumulation).
    a4 = _make_inputs(ks[3], B=2, S=16, in_dim=64, hid=256, w_dtype=jnp.bfloat16)
    p4 = prepare_params(*a4[1:])
    o4 = jax.block_until_ready(mlp_res_block(a4[0], p4, force_hid_block=128))
    assert o4.shape == a4[0].shape
    assert jnp.allclose(o4, _reference(*a4), atol=3e-2, rtol=3e-2), "case4 mismatch"

    print("KERNEL_OK")
</pallas_src>

<mosaic_0001>
module attributes {stable_mosaic.version = 11 : i64} {
  func.func @_mlp_res_kernel(%arg0: i32, %arg1: memref<16x128xf32, #tpu.memory_space<vmem>>, %arg2: memref<1x128xf32, #tpu.memory_space<vmem>>, %arg3: memref<1x128xf32, #tpu.memory_space<vmem>>, %arg4: memref<128x128xf32, #tpu.memory_space<vmem>>, %arg5: memref<1x128xf32, #tpu.memory_space<vmem>>, %arg6: memref<128x128xf32, #tpu.memory_space<vmem>>, %arg7: memref<1x128xf32, #tpu.memory_space<vmem>>, %arg8: memref<16x128xf32, #tpu.memory_space<vmem>>) attributes {dimension_semantics = [#tpu.dimension_semantics<parallel>], iteration_bounds = array<i64: 1>, scalar_prefetch = 0 : i64, scratch_operands = 0 : i64, tpu.core_type = #tpu.core_type<tc>, window_params = [{transform_indices = @transform_0, window_bounds = array<i64: 16, 128>}, {pipeline_mode = #tpu.pipeline_mode<synchronous>, transform_indices = @transform_1, window_bounds = array<i64: 1, 128>}, {pipeline_mode = #tpu.pipeline_mode<synchronous>, transform_indices = @transform_2, window_bounds = array<i64: 1, 128>}, {pipeline_mode = #tpu.pipeline_mode<synchronous>, transform_indices = @transform_3, window_bounds = array<i64: 128, 128>}, {pipeline_mode = #tpu.pipeline_mode<synchronous>, transform_indices = @transform_4, window_bounds = array<i64: 1, 128>}, {pipeline_mode = #tpu.pipeline_mode<synchronous>, transform_indices = @transform_5, window_bounds = array<i64: 128, 128>}, {pipeline_mode = #tpu.pipeline_mode<synchronous>, transform_indices = @transform_6, window_bounds = array<i64: 1, 128>}, {transform_indices = @transform_7, window_bounds = array<i64: 16, 128>}]} {
    %c0 = arith.constant 0 : index
    %c0_0 = arith.constant 0 : index
    %0 = vector.load %arg1[%c0, %c0_0] : memref<16x128xf32, #tpu.memory_space<vmem>>, vector<16x128xf32>
    %c0_1 = arith.constant 0 : index
    %c0_2 = arith.constant 0 : index
    %1 = vector.load %arg2[%c0_1, %c0_2] : memref<1x128xf32, #tpu.memory_space<vmem>>, vector<1x128xf32>
    %c0_3 = arith.constant 0 : index
    %c0_4 = arith.constant 0 : index
    %2 = vector.load %arg3[%c0_3, %c0_4] : memref<1x128xf32, #tpu.memory_space<vmem>>, vector<1x128xf32>
    %cst = arith.constant dense<0.000000e+00> : vector<16xf32>
    %3 = vector.multi_reduction <add>, %0, %cst [1] : vector<16x128xf32> to vector<16xf32>
    %4 = vector.shape_cast %3 : vector<16xf32> to vector<16x1xf32>
    %cst_5 = arith.constant 3.125000e-02 : f32
    %5 = vector.broadcast %cst_5 : f32 to vector<16x1xf32>
    %6 = arith.mulf %4, %5 : vector<16x1xf32>
    %7 = vector.broadcast %6 : vector<16x1xf32> to vector<16x128xf32>
    %8 = arith.subf %0, %7 : vector<16x128xf32>
    %9 = arith.mulf %8, %8 : vector<16x128xf32>
    %cst_6 = arith.constant dense<0.000000e+00> : vector<16xf32>
    %10 = vector.multi_reduction <add>, %9, %cst_6 [1] : vector<16x128xf32> to vector<16xf32>
    %11 = vector.shape_cast %10 : vector<16xf32> to vector<16x1xf32>
    %12 = arith.mulf %6, %6 : vector<16x1xf32>
    %cst_7 = arith.constant 9.600000e+01 : f32
    %13 = vector.broadcast %cst_7 : f32 to vector<16x1xf32>
    %14 = arith.mulf %13, %12 : vector<16x1xf32>
    %15 = arith.subf %11, %14 : vector<16x1xf32>
    %cst_8 = arith.constant 3.125000e-02 : f32
    %16 = vector.broadcast %cst_8 : f32 to vector<16x1xf32>
    %17 = arith.mulf %15, %16 : vector<16x1xf32>
    %cst_9 = arith.constant 9.99999997E-7 : f32
    %18 = vector.broadcast %cst_9 : f32 to vector<16x1xf32>
    %19 = arith.addf %17, %18 : vector<16x1xf32>
    %20 = math.rsqrt %19 : vector<16x1xf32>
    %21 = vector.broadcast %20 : vector<16x1xf32> to vector<16x128xf32>
    %22 = arith.mulf %8, %21 : vector<16x128xf32>
    %23 = vector.broadcast %1 : vector<1x128xf32> to vector<16x128xf32>
    %24 = arith.mulf %22, %23 : vector<16x128xf32>
    %25 = vector.broadcast %2 : vector<1x128xf32> to vector<16x128xf32>
    %26 = arith.addf %24, %25 : vector<16x128xf32>
    %c0_10 = arith.constant 0 : index
    %c0_11 = arith.constant 0 : index
    %27 = vector.load %arg4[%c0_10, %c0_11] : memref<128x128xf32, #tpu.memory_space<vmem>>, vector<128x128xf32>
    %cst_12 = arith.constant dense<0.000000e+00> : vector<16x128xf32>
    %28 = tpu.matmul %26, %27, %cst_12 {dimension_numbers = #tpu.dot_dimension_numbers<[1], [0], [0], [1], [0, 0, 1, 1], [], []>} : vector<16x128xf32>, vector<128x128xf32>, vector<16x128xf32> -> vector<16x128xf32>
    %c0_13 = arith.constant 0 : index
    %c0_14 = arith.constant 0 : index
    %29 = vector.load %arg5[%c0_13, %c0_14] : memref<1x128xf32, #tpu.memory_space<vmem>>, vector<1x128xf32>
    %30 = vector.broadcast %29 : vector<1x128xf32> to vector<16x128xf32>
    %31 = arith.addf %28, %30 : vector<16x128xf32>
    %cst_15 = arith.constant 0.000000e+00 : f32
    %32 = vector.broadcast %cst_15 : f32 to vector<16x128xf32>
    %33 = arith.maximumf %31, %32 : vector<16x128xf32>
    %c0_16 = arith.constant 0 : index
    %c0_17 = arith.constant 0 : index
    %34 = vector.load %arg6[%c0_16, %c0_17] : memref<128x128xf32, #tpu.memory_space<vmem>>, vector<128x128xf32>
    %cst_18 = arith.constant dense<0.000000e+00> : vector<16x128xf32>
    %35 = tpu.matmul %33, %34, %cst_18 {dimension_numbers = #tpu.dot_dimension_numbers<[1], [0], [0], [1], [0, 0, 1, 1], [], []>} : vector<16x128xf32>, vector<128x128xf32>, vector<16x128xf32> -> vector<16x128xf32>
    %36 = arith.addf %0, %35 : vector<16x128xf32>
    %c0_19 = arith.constant 0 : index
    %c0_20 = arith.constant 0 : index
    %37 = vector.load %arg7[%c0_19, %c0_20] : memref<1x128xf32, #tpu.memory_space<vmem>>, vector<1x128xf32>
    %38 = vector.broadcast %37 : vector<1x128xf32> to vector<16x128xf32>
    %39 = arith.addf %36, %38 : vector<16x128xf32>
    %c0_21 = arith.constant 0 : index
    %c0_22 = arith.constant 0 : index
    %40 = vector.load %arg8[%c0_21, %c0_22] : memref<16x128xf32, #tpu.memory_space<vmem>>, vector<16x128xf32>
    tpu.vector_store %arg8[%c0_21, %c0_22], %39 {strides = array<i32>} : memref<16x128xf32, #tpu.memory_space<vmem>>, vector<16x128xf32>,
    return
  }
  func.func @transform_0(%arg0: i32) -> (i32, i32) {
    %c0_i32 = arith.constant 0 : i32
    %c0_i32_0 = arith.constant 0 : i32
    return %arg0, %c0_i32 : i32, i32
  }
  func.func @transform_1(%arg0: i32) -> (i32, i32) {
    %c0_i32 = arith.constant 0 : i32
    %c0_i32_0 = arith.constant 0 : i32
    %c0_i32_1 = arith.constant 0 : i32
    return %c0_i32, %c0_i32_0 : i32, i32
  }
  func.func @transform_2(%arg0: i32) -> (i32, i32) {
    %c0_i32 = arith.constant 0 : i32
    %c0_i32_0 = arith.constant 0 : i32
    %c0_i32_1 = arith.constant 0 : i32
    return %c0_i32, %c0_i32_0 : i32, i32
  }
  func.func @transform_3(%arg0: i32) -> (i32, i32) {
    %c0_i32 = arith.constant 0 : i32
    %c0_i32_0 = arith.constant 0 : i32
    %c0_i32_1 = arith.constant 0 : i32
    return %c0_i32, %c0_i32_0 : i32, i32
  }
  func.func @transform_4(%arg0: i32) -> (i32, i32) {
    %c0_i32 = arith.constant 0 : i32
    %c0_i32_0 = arith.constant 0 : i32
    %c0_i32_1 = arith.constant 0 : i32
    return %c0_i32, %c0_i32_0 : i32, i32
  }
  func.func @transform_5(%arg0: i32) -> (i32, i32) {
    %c0_i32 = arith.constant 0 : i32
    %c0_i32_0 = arith.constant 0 : i32
    %c0_i32_1 = arith.constant 0 : i32
    return %c0_i32, %c0_i32_0 : i32, i32
  }
  func.func @transform_6(%arg0: i32) -> (i32, i32) {
    %c0_i32 = arith.constant 0 : i32
    %c0_i32_0 = arith.constant 0 : i32
    %c0_i32_1 = arith.constant 0 : i32
    return %c0_i32, %c0_i32_0 : i32, i32
  }
  func.func @transform_7(%arg0: i32) -> (i32, i32) {
    %c0_i32 = arith.constant 0 : i32
    %c0_i32_0 = arith.constant 0 : i32
    return %arg0, %c0_i32 : i32, i32
  }
}

</mosaic_0001>

<bundles_post_ra>
// kernel: tpu_custom_call.1
= control target key start
LH: loop header
LB: loop body
LE: loop exit
PB: predicated region body
PF: predicated region fallthrough
CT: control target
= control target key end

     0   :  { %12 = vsyncpa [#allocation3], 0  ;;  %s948_s0 = inlined_call_operand.hbm [shape: f32[16,128], index: 0, kind: input, shape index: {}]   ;;  %s949_s1 = inlined_call_operand.hbm [shape: f32[1,128], index: 1, kind: input, shape index: {}]   ;;  %s950_s2 = inlined_call_operand.hbm [shape: f32[1,128], index: 2, kind: input, shape index: {}]   ;;  %s951_s3 = inlined_call_operand.hbm [shape: f32[128,128], index: 3, kind: input, shape index: {}]   ;;  %s952_s4 = inlined_call_operand.hbm [shape: f32[1,128], index: 4, kind: input, shape index: {}]   ;;  %s953_s5 = inlined_call_operand.hbm [shape: f32[128,128], index: 5, kind: input, shape index: {}]   ;;  %s954_s6 = inlined_call_operand.hbm [shape: f32[1,128], index: 6, kind: input, shape index: {}]   ;;  %s955_s7 = inlined_call_operand.hbm [shape: f32[16,128], index: 7, kind: output, shape index: {}]  }
   0x1   :  { %13 = vsyncpa [#allocation6], 0 }
   0x2   :  { %14 = vsyncpa [#allocation9], 0 }
   0x3   :  { %15 = vsyncpa [#allocation12], 0 }
   0x4   :  { %16 = vsyncpa [#allocation4], 0  ;;  %s760_s24 = smov [#allocation5]   ;;  %s574_s28 = scalar_lea.hbm %s949_s1, 16 }
   0x5   :  { %s35_s25 = sshll.u32 %s760_s24, 4  ;;  %p575_p0 = scmp.ne.s32.totalorder %s949_s1, %s574_s28  ;;  %s36_s25 = int_to_ptr.vmem [resolvable:$true] %s35_s25 }
   0x6   :  { %p578_p1 = scmp.lt.u32.totalorder %s574_s28, %s949_s1 }
   0x8   :  { %p580_p2 = pnand %p578_p1, %p575_p0 }
   0xa   :  { %583 = shalt.err (!%p580_p2)
}
   0xb   :  { %s584_s10 = scalar_lea.vmem %s36_s25, 16  ;;  %s588_s11 = scalar_lea.vmem %s36_s25, 32 }
   0xc   :  { %p585_p3 = scmp.ne.s32.totalorder %s36_s25, %s584_s10  ;;  %p589_p4 = scmp.lt.s32.totalorder %s36_s25, %s36_s25 }
   0xd   :  { %p590_p5 = scmp.lt.s32.totalorder %s588_s11, %s584_s10 }
   0xf   :  { %p591_p6 = por %p590_p5, %p589_p4 }
  0x11   :  { %p592_p7 = pnand %p591_p6, %p585_p3 }
  0x13   :  { %595 = shalt.err (!%p592_p7)
}
  0x14   :  { %38 = dma.hbm_to_vmem [thread:$0]  %s949_s1, 16, %s36_s25, [#allocation6]  }
  0x15   :  { %s761_s14 = smov [#allocation8]   ;;  %s762_s16 = smov [#allocation11]  }
  0x16   :  { %s54_s15 = sshll.u32 %s761_s14, 4  ;;  %s76_s17 = sshll.u32 %s762_s16, 4  ;;  %s55_s15 = int_to_ptr.vmem [resolvable:$true] %s54_s15  ;;  %s77_s17 = int_to_ptr.vmem [resolvable:$true] %s76_s17 }
  0x17   :  { %s596_s20 = scalar_lea.hbm %s951_s3, 2048 }
  0x18   :  { %p597_p8 = scmp.ne.s32.totalorder %s951_s3, %s596_s20  ;;  %p600_p9 = scmp.lt.u32.totalorder %s596_s20, %s951_s3 }
  0x1a   :  { %p602_p10 = pnand %p600_p9, %p597_p8 }
  0x1c   :  { %605 = shalt.err (!%p602_p10)
}
  0x1d   :  { %s606_s1 = scalar_lea.vmem %s55_s15, 2048  ;;  %p611_p12 = scmp.lt.s32.totalorder %s55_s15, %s55_s15 }
  0x1e   :  { %p607_p11 = scmp.ne.s32.totalorder %s55_s15, %s606_s1  ;;  %p612_p13 = scmp.lt.s32.totalorder %s606_s1, %s606_s1 }
  0x20   :  { %p613_p0 = por %p612_p13, %p611_p12 }
  0x22   :  { %p614_p1 = pnand %p613_p0, %p607_p11 }
  0x24   :  { %617 = shalt.err (!%p614_p1)
}
  0x25   :  { %s763_s25 = smov 128   ;;  %s764_s26 = smov 8  }
  0x26   :  { %60 = dma.hbm_to_vmem [thread:$0]  %s951_s3, 2048, %s55_s15, [#allocation9], %s763_s25, %s763_s25, %s764_s26  }
  0x27   :  { %s618_s8 = scalar_lea.hbm %s953_s5, 2048 }
  0x28   :  { %p619_p2 = scmp.ne.s32.totalorder %s953_s5, %s618_s8  ;;  %p622_p3 = scmp.lt.u32.totalorder %s618_s8, %s953_s5 }
  0x2a   :  { %p624_p4 = pnand %p622_p3, %p619_p2 }
  0x2c   :  { %627 = shalt.err (!%p624_p4)
}
  0x2d   :  { %s628_s13 = scalar_lea.vmem %s77_s17, 2048  ;;  %p633_p6 = scmp.lt.s32.totalorder %s77_s17, %s77_s17 }
  0x2e   :  { %p629_p5 = scmp.ne.s32.totalorder %s77_s17, %s628_s13  ;;  %p634_p7 = scmp.lt.s32.totalorder %s628_s13, %s628_s13 }
  0x30   :  { %p635_p8 = por %p634_p7, %p633_p6 }
  0x32   :  { %p636_p9 = pnand %p635_p8, %p629_p5 }
  0x34   :  { %639 = shalt.err (!%p636_p9)
}
  0x35   :  { %82 = dma.hbm_to_vmem [thread:$0]  %s953_s5, 2048, %s77_s17, [#allocation12], %s763_s25, %s763_s25, %s764_s26  }
  0x36   :  { %s765_s15 = smov [#allocation2]   ;;  %s766_s18 = smov [#allocation7]  }
  0x37   :  { %s22_s16 = sshll.u32 %s765_s15, 4  ;;  %s45_s19 = sshll.u32 %s766_s18, 4  ;;  %s23_s16 = int_to_ptr.vmem [resolvable:$true] %s22_s16  ;;  %s46_s19 = int_to_ptr.vmem [resolvable:$true] %s45_s19 }
  0x38   :  { %s640_s22 = scalar_lea.hbm %s948_s0, 256 }
  0x39   :  { %p641_p10 = scmp.ne.s32.totalorder %s948_s0, %s640_s22  ;;  %p644_p11 = scmp.lt.u32.totalorder %s640_s22, %s948_s0 }
  0x3b   :  { %p646_p12 = pnand %p644_p11, %p641_p10 }
  0x3d   :  { %649 = shalt.err (!%p646_p12)
}
  0x3e   :  { %s650_s5 = scalar_lea.vmem %s23_s16, 256  ;;  %p655_p0 = scmp.lt.s32.totalorder %s23_s16, %s23_s16 }
  0x3f   :  { %p651_p13 = scmp.ne.s32.totalorder %s23_s16, %s650_s5  ;;  %p656_p1 = scmp.lt.s32.totalorder %s650_s5, %s650_s5 }
  0x41   :  { %p657_p2 = por %p656_p1, %p655_p0 }
  0x43   :  { %p658_p3 = pnand %p657_p2, %p651_p13 }
  0x45   :  { %661 = shalt.err (!%p658_p3)
}
  0x46   :  { %28 = dma.hbm_to_vmem [thread:$0]  %s948_s0, 256, %s23_s16, [#allocation3], %s763_s25, %s763_s25, %s764_s26  }
  0x47   :  { %s662_s8 = scalar_lea.hbm %s950_s2, 16 }
  0x48   :  { %p663_p4 = scmp.ne.s32.totalorder %s950_s2, %s662_s8  ;;  %p666_p5 = scmp.lt.u32.totalorder %s662_s8, %s950_s2 }
  0x4a   :  { %p668_p6 = pnand %p666_p5, %p663_p4 }
  0x4c   :  { %671 = shalt.err (!%p668_p6)
}
  0x4d   :  { %s672_s13 = scalar_lea.vmem %s46_s19, 16  ;;  %s676_s3 = scalar_lea.vmem %s46_s19, 32 }
  0x4e   :  { %p673_p7 = scmp.ne.s32.totalorder %s46_s19, %s672_s13  ;;  %p677_p8 = scmp.lt.s32.totalorder %s46_s19, %s46_s19 }
  0x4f   :  { %p678_p9 = scmp.lt.s32.totalorder %s676_s3, %s672_s13 }
  0x51   :  { %p679_p10 = por %p678_p9, %p677_p8 }
  0x53   :  { %p680_p11 = pnand %p679_p10, %p673_p7 }
  0x55   :  { %683 = shalt.err (!%p680_p11)
}
  0x56   :  { %48 = dma.hbm_to_vmem [thread:$0]  %s950_s2, 16, %s46_s19, [#allocation6]  }
  0x57   :  { %s767_s15 = smov [#allocation10]   ;;  %s768_s18 = smov [#allocation13]  }
  0x58   :  { %s67_s16 = sshll.u32 %s767_s15, 4  ;;  %s89_s20 = sshll.u32 %s768_s18, 4  ;;  %s68_s16 = int_to_ptr.vmem [resolvable:$true] %s67_s16  ;;  %s90_s20 = int_to_ptr.vmem [resolvable:$true] %s89_s20 }
  0x59   :  { %s684_s23 = scalar_lea.hbm %s952_s4, 16 }
  0x5a   :  { %p685_p12 = scmp.ne.s32.totalorder %s952_s4, %s684_s23  ;;  %p688_p13 = scmp.lt.u32.totalorder %s684_s23, %s952_s4 }
  0x5c   :  { %p690_p0 = pnand %p688_p13, %p685_p12 }
  0x5e   :  { %693 = shalt.err (!%p690_p0)
}
  0x5f   :  { %s694_s2 = scalar_lea.vmem %s68_s16, 16  ;;  %s698_s19 = scalar_lea.vmem %s68_s16, 32 }
  0x60   :  { %p695_p1 = scmp.ne.s32.totalorder %s68_s16, %s694_s2  ;;  %p699_p2 = scmp.lt.s32.totalorder %s68_s16, %s68_s16 }
  0x61   :  { %p700_p3 = scmp.lt.s32.totalorder %s698_s19, %s694_s2 }
  0x63   :  { %p701_p4 = por %p700_p3, %p699_p2 }
  0x65   :  { %p702_p5 = pnand %p701_p4, %p695_p1 }
  0x67   :  { %705 = shalt.err (!%p702_p5)
}
  0x68   :  { %70 = dma.hbm_to_vmem [thread:$0]  %s952_s4, 16, %s68_s16, [#allocation9]  }
  0x69   :  { %s706_s8 = scalar_lea.hbm %s954_s6, 16 }
  0x6a   :  { %p707_p6 = scmp.ne.s32.totalorder %s954_s6, %s706_s8  ;;  %p710_p7 = scmp.lt.u32.totalorder %s706_s8, %s954_s6 }
  0x6c   :  { %p712_p8 = pnand %p710_p7, %p707_p6 }
  0x6e   :  { %715 = shalt.err (!%p712_p8)
}
  0x6f   :  { %s716_s13 = scalar_lea.vmem %s90_s20, 16  ;;  %s720_s3 = scalar_lea.vmem %s90_s20, 32 }
  0x70   :  { %p717_p9 = scmp.ne.s32.totalorder %s90_s20, %s716_s13  ;;  %p721_p10 = scmp.lt.s32.totalorder %s90_s20, %s90_s20 }
  0x71   :  { %p722_p11 = scmp.lt.s32.totalorder %s720_s3, %s716_s13 }
  0x73   :  { %p723_p12 = por %p722_p11, %p721_p10 }
  0x75   :  { %p724_p13 = pnand %p723_p12, %p717_p9 }
  0x77   :  { %727 = shalt.err (!%p724_p13)
}
  0x78   :  { %92 = dma.hbm_to_vmem [thread:$0]  %s954_s6, 16, %s90_s20, [#allocation12]  }
  0x79   :  { %750 = dma.done.wait [#allocation3], 256  }
  0x7a   :  { %751 = vsyncadd [#allocation3], 4294967040 }
  0x7b   :  { %752 = dma.done.wait [#allocation6], 32  }
  0x7c   :  { %753 = vsyncadd [#allocation6], 4294967264 }
  0x7d   :  { %754 = dma.done.wait [#allocation9], 2064  }
  0x7e   :  { %755 = vsyncadd [#allocation9], 4294965232 }
  0x7f   :  { %756 = dma.done.wait [#allocation12], 2064  }
  0x80   :  { %757 = vsyncadd [#allocation12], 4294965232  ;;  %v903_v0 = vld [vmem:[#allocation2] sm:$0xff]  ;;  %v906_v1 = vld [vmem:[#allocation2 + $0x8] sm:$0xff]  ;;  %s769_s6 = smov [#allocation14]  }
  0x81   :  { %118 = vadd.xlane.f32.xlu0 %v903_v0  ;;  %v162_v2 = vld [vmem:[#allocation8] sm:$0xff]  ;;  %v163_v3 = vld [vmem:[#allocation8 + $0x8] sm:$0xff]  ;;  %v164_v4 = vld [vmem:[#allocation8 + $0x10] sm:$0xff]  ;;  %s371_s14 = sshll.u32 %s769_s6, 4  ;;  %s372_s14 = int_to_ptr.vmem [resolvable:$true] %s371_s14 }
  0x82   :  { %v496_v5 = vpack.c.bf16 %v163_v3, %v162_v2  ;;  %v165_v6 = vld [vmem:[#allocation8 + $0x18] sm:$0xff]  ;;  %v166_v16 = vld [vmem:[#allocation8 + $0x20] sm:$0xff]  ;;  %v167_v17 = vld [vmem:[#allocation8 + $0x28] sm:$0xff]  ;;  %s728_s15 = scalar_lea.vmem %s372_s14, 256  ;;  %p733_p1 = scmp.lt.s32.totalorder %s372_s14, %s372_s14 }
  0x83   :  { %v500_v7 = vpack.c.bf16 %v165_v6, %v164_v4  ;;  %v504_v18 = vpack.c.bf16 %v167_v17, %v166_v16  ;;  %v168_v19 = vld [vmem:[#allocation8 + $0x30] sm:$0xff]  ;;  %v169_v20 = vld [vmem:[#allocation8 + $0x38] sm:$0xff]  ;;  %v170_v22 = vld [vmem:[#allocation8 + $0x40] sm:$0xff]  ;;  %p729_p0 = scmp.ne.s32.totalorder %s372_s14, %s728_s15  ;;  %p734_p2 = scmp.lt.s32.totalorder %s728_s15, %s728_s15 }
  0x84   :  { %497 = vmatprep.subr.bf16.mxu0 %v496_v5  ;;  %v508_v21 = vpack.c.bf16 %v169_v20, %v168_v19  ;;  %v171_v23 = vld [vmem:[#allocation8 + $0x48] sm:$0xff]  ;;  %v172_v25 = vld [vmem:[#allocation8 + $0x50] sm:$0xff]  ;;  %v173_v26 = vld [vmem:[#allocation8 + $0x58] sm:$0xff] }
  0x85   :  { %120 = vadd.xlane.f32.xlu0 %v906_v1  ;;  %499 = vmatpush3.bf16.msra.mxu0 %v496_v5  ;;  %v512_v24 = vpack.c.bf16 %v171_v23, %v170_v22  ;;  %v174_v27 = vld [vmem:[#allocation8 + $0x60] sm:$0xff]  ;;  %v516_v28 = vpack.c.bf16 %v173_v26, %v172_v25  ;;  %v175_v29 = vld [vmem:[#allocation8 + $0x68] sm:$0xff]  ;;  %v176_v31 = vld [vmem:[#allocation8 + $0x70] sm:$0xff]  ;;  %p735_p3 = por %p734_p2, %p733_p1 }
  0x86   :  { %501 = vmatprep.subr.bf16.mxu0 %v500_v7  ;;  %v520_v30 = vpack.c.bf16 %v175_v29, %v174_v27  ;;  %v177_v32 = vld [vmem:[#allocation8 + $0x78] sm:$0xff]  ;;  %v262_v34 = vld [vmem:[#allocation11] sm:$0xff]  ;;  %v263_v35 = vld [vmem:[#allocation11 + $0x8] sm:$0xff] }
  0x87   :  { %v524_v33 = vpack.c.bf16 %v177_v32, %v176_v31  ;;  %v264_v36 = vld [vmem:[#allocation11 + $0x10] sm:$0xff]  ;;  %v528_v37 = vpack.c.bf16 %v263_v35, %v262_v34  ;;  %v265_v38 = vld [vmem:[#allocation11 + $0x18] sm:$0xff]  ;;  %v266_v40 = vld [vmem:[#allocation11 + $0x20] sm:$0xff]  ;;  %p736_p4 = pnand %p735_p3, %p729_p0 }
  0x88   :  { %v532_v39 = vpack.c.bf16 %v265_v38, %v264_v36  ;;  %v267_v41 = vld [vmem:[#allocation11 + $0x28] sm:$0xff]  ;;  %v268_v43 = vld [vmem:[#allocation11 + $0x30] sm:$0xff]  ;;  %v269_v44 = vld [vmem:[#allocation11 + $0x38] sm:$0xff] }
  0x89   :  { %503 = vmatpush3.bf16.msra.mxu0 %v500_v7  ;;  %529 = vmatprep.subr.bf16.mxu1 %v528_v37  ;;  %v536_v42 = vpack.c.bf16 %v267_v41, %v266_v40  ;;  %v540_v45 = vpack.c.bf16 %v269_v44, %v268_v43  ;;  %v270_v46 = vld [vmem:[#allocation11 + $0x40] sm:$0xff]  ;;  %v271_v47 = vld [vmem:[#allocation11 + $0x48] sm:$0xff]  ;;  %v272_v49 = vld [vmem:[#allocation11 + $0x50] sm:$0xff] }
  0x8a   :  { %505 = vmatprep.subr.bf16.mxu0 %v504_v18  ;;  %531 = vmatpush3.bf16.msra.mxu1 %v528_v37  ;;  %v544_v48 = vpack.c.bf16 %v271_v47, %v270_v46  ;;  %v273_v50 = vld [vmem:[#allocation11 + $0x58] sm:$0xff]  ;;  %v274_v52 = vld [vmem:[#allocation11 + $0x60] sm:$0xff]  ;;  %v275_v53 = vld [vmem:[#allocation11 + $0x68] sm:$0xff] }
  0x8b   :  { %533 = vmatprep.subr.bf16.mxu1 %v532_v39  ;;  %v548_v51 = vpack.c.bf16 %v273_v50, %v272_v49  ;;  %v552_v54 = vpack.c.bf16 %v275_v53, %v274_v52  ;;  %v386_v6 = vld [vmem:[#allocation5] ss:$0 sm:$0xff]  ;;  %v276_v17 = vld [vmem:[#allocation11 + $0x70] sm:$0xff]  ;;  %v388_v20 = vld [vmem:[#allocation10] ss:$0 sm:$0xff] }
  0x8c   :  { %v389_v26 = vld [vmem:[#allocation13] ss:$0 sm:$0xff] }
  0x8d   :  { %507 = vmatpush3.bf16.msra.mxu0 %v504_v18  ;;  %v277_v18 = vld [vmem:[#allocation11 + $0x78] sm:$0xff] }
  0x8e   :  { %509 = vmatprep.subr.bf16.mxu0 %v508_v21  ;;  %535 = vmatpush3.bf16.msra.mxu1 %v532_v39  ;;  %v556_v19 = vpack.c.bf16 %v277_v18, %v276_v17 }
  0x8f   :  { %537 = vmatprep.subr.bf16.mxu1 %v536_v42 }
  0x91   :  { %511 = vmatpush3.bf16.msra.mxu0 %v508_v21 }
  0x92   :  { %513 = vmatprep.subr.bf16.mxu0 %v512_v24  ;;  %539 = vmatpush3.bf16.msra.mxu1 %v536_v42 }
  0x93   :  { %541 = vmatprep.subr.bf16.mxu1 %v540_v45 }
  0x95   :  { %515 = vmatpush3.bf16.msra.mxu0 %v512_v24 }
  0x96   :  { %517 = vmatprep.subr.bf16.mxu0 %v516_v28  ;;  %543 = vmatpush3.bf16.msra.mxu1 %v540_v45 }
  0x97   :  { %545 = vmatprep.subr.bf16.mxu1 %v544_v48 }
  0x99   :  { %519 = vmatpush3.bf16.msra.mxu0 %v516_v28 }
  0x9a   :  { %521 = vmatprep.subr.bf16.mxu0 %v520_v30  ;;  %547 = vmatpush3.bf16.msra.mxu1 %v544_v48 }
  0x9b   :  { %549 = vmatprep.subr.bf16.mxu1 %v548_v51 }
  0x9d   :  { %523 = vmatpush3.bf16.msra.mxu0 %v520_v30 }
  0x9e   :  { %525 = vmatprep.subr.bf16.mxu0 %v524_v33  ;;  %551 = vmatpush3.bf16.msra.mxu1 %v548_v51 }
  0x9f   :  { %553 = vmatprep.subr.bf16.mxu1 %v552_v54 }
  0xa1   :  { %527 = vmatpush3.bf16.msra.mxu0 %v524_v33 }
  0xa2   :  { %555 = vmatpush3.bf16.msra.mxu1 %v552_v54 }
  0xa3   :  { %557 = vmatprep.subr.bf16.mxu1 %v556_v19 }
  0xa6   :  { %559 = vmatpush3.bf16.msra.mxu1 %v556_v19 }
 0x10e   :  { %v119_v8 = vpop.xlane.xlu0 %118 }
 0x10f   :  { %v909_v9 = vmul.f32 0.03125, %v119_v8  ;;  %v387_v8 = vld [vmem:[#allocation7] ss:$0 sm:$0xff] }
 0x111   :  { %v913_v10 = vsub.f32 %v903_v0, %v909_v9  ;;  %v132_v55 = vmul.f32 %v909_v9, %v909_v9 }
 0x112   :  { %v121_v11 = vpop.xlane.xlu0 %120 }
 0x113   :  { %v915_v12 = vmul.f32 0.03125, %v121_v11  ;;  %v126_v13 = vmul.f32 %v913_v10, %v913_v10  ;;  %v134_v57 = vmul.f32 96.0, %v132_v55 }
 0x115   :  { %v921_v14 = vsub.f32 %v906_v1, %v915_v12  ;;  %128 = vadd.xlane.f32.xlu1 %v126_v13  ;;  %v133_v56 = vmul.f32 %v915_v12, %v915_v12 }
 0x117   :  { %v127_v15 = vmul.f32 %v921_v14, %v921_v14  ;;  %v135_v60 = vmul.f32 96.0, %v133_v56 }
 0x119   :  { %130 = vadd.xlane.f32.xlu1 %v127_v15 }
 0x1a2   :  { %v129_v58 = vpop.xlane.xlu1 %128 }
 0x1a3   :  { %v136_v59 = vsub.f32 %v129_v58, %v134_v57 }
 0x1a5   :  { %v138_v61 = vmul.f32 0.03125, %v136_v59 }
 0x1a6   :  { %v131_v62 = vpop.xlane.xlu1 %130 }
 0x1a7   :  { %v140_v63 = vadd.f32 1e-06, %v138_v61  ;;  %v137_v2 = vsub.f32 %v131_v62, %v135_v60 }
 0x1a9   :  { %570 = vrsqrt.f32 %v140_v63  ;;  %v139_v3 = vmul.f32 0.03125, %v137_v2 }
 0x1ab   :  { %v141_v4 = vadd.f32 1e-06, %v139_v3 }
 0x1ad   :  { %572 = vrsqrt.f32 %v141_v4 }
 0x1b3   :  { %v571_v5 = vpop.eup %570 }
 0x1b4   :  { %v144_v7 = vmul.f32 %v571_v5, %v913_v10 }
 0x1b6   :  { %v152_v9 = vmul.f32 %v386_v6, %v144_v7 }
 0x1b7   :  { %v573_v11 = vpop.eup %572 }
 0x1b8   :  { %v145_v12 = vmul.f32 %v573_v11, %v921_v14  ;;  %v160_v13 = vadd.f32 %v387_v8, %v152_v9 }
 0x1ba   :  { %v153_v15 = vmul.f32 %v386_v6, %v145_v12  ;;  %458 = vmatprep.mubr.f32.mxu0 %v160_v13 }
 0x1bc   :  { %v161_v16 = vadd.f32 %v387_v8, %v153_v15 }
 0x1be   :  { %459 = vmatmul.mubr.f32.vlgmr.msra.gmra.mrb[0].mxu0 %v161_v16 }
 0x291   :  { %v460_v21 = vpop.f32.mrb[0].mxu0 }
 0x292   :  { %v257_v22 = vadd.f32 %v460_v21, %v388_v20  ;;  %v251_v23 = vpop.f32.mrb[1].mxu0 }
 0x293   :  { %v252_v10 = vadd.f32 %v388_v20, %v251_v23 }
 0x294   :  { %v261_v25 = vmax.f32 %v257_v22, 0.0 }
 0x295   :  { %v260_v24 = vmax.f32 %v252_v10, 0.0 }
 0x297   :  { %493 = vmatprep.mubr.f32.mxu1 %v260_v24 }
 0x298   :  { %494 = vmatmul.mubr.f32.vlgmr.msra.gmra.mrb[0].mxu1 %v261_v25 }
 0x36b   :  { %v495_v14 = vpop.f32.mrb[0].mxu1 }
 0x36c   :  { %v354_v27 = vadd.f32 %v495_v14, %v906_v1  ;;  %v344_v28 = vpop.f32.mrb[1].mxu1 }
 0x36d   :  { %v353_v29 = vadd.f32 %v344_v28, %v903_v0 }
 0x36e   :  { %v363_v30 = vadd.f32 %v389_v26, %v354_v27 }
 0x36f   :  { %v362_v31 = vadd.f32 %v389_v26, %v353_v29 }
 0x370   :  { %365 = vst [vmem:[#allocation14 + $0x8] sm:$0xff] %v363_v30 }
 0x371   :  { %364 = vst [vmem:[#allocation14] sm:$0xff] %v362_v31 }
 0x372   :  { %739 = shalt.err (!%p736_p4)
}
 0x373   :  { %s740_s20 = scalar_lea.hbm %s955_s7, 256 }
 0x374   :  { %p741_p5 = scmp.ne.s32.totalorder %s955_s7, %s740_s20  ;;  %p744_p6 = scmp.lt.u32.totalorder %s740_s20, %s955_s7 }
 0x376   :  { %p746_p7 = pnand %p744_p6, %p741_p5 }
 0x378   :  { %749 = shalt.err (!%p746_p7)
}
 0x379   :  { %377 = dma.vmem_to_hbm [thread:$0]  %s372_s14, 256, %s955_s7, [#allocation4], %s763_s25, %s763_s25, %s764_s26  }
 0x37a   :  { %758 = dma.done.wait [#allocation4], 256  }
 0x37b   :  { %759 = vsyncadd [#allocation4], 4294967040 }
 0x37c   :  { %381 = vsyncpa [#allocation3], 1 }
 0x37d   :  { %382 = vsyncpa [#allocation6], 1 }
 0x37e   :  { %383 = vsyncpa [#allocation9], 1 }
 0x37f   :  { %384 = vsyncpa [#allocation12], 1 }
 0x380   :  { %385 = vsyncpa [#allocation4], 1 }

</bundles_post_ra>
